<compile_context>
chip_gen: v7x
topology: tpu7x:2x2x1
jax: 0.10.0
libtpu: 0.0.40
codegen_flags: <defaults>
</compile_context>

<pallas_src>
import functools

import jax
import jax.numpy as jnp
from jax.experimental import pallas as pl
from jax.experimental.pallas import tpu as pltpu


# ----------------------------------------------------------------------------
# Fused Pallas kernel: stem matmul -> head matmul -> avg-pool (accumulate) -> FC
# ----------------------------------------------------------------------------
def _encoder_fused_kernel(patch_ref, ws_ref, bs_ref, wh_ref, bh_ref,
                          wf_ref, bf_ref, o_ref, *maybe_acc, single_step):
    """One grid step = (TB batch elements) x (one HW tile).

    stem  : silu(patches @ w_stem + b_stem)   (BN scale pre-folded into w_stem)
    head  : silu(stem    @ w_head + b_head)   (BN scale pre-folded into w_head)
    pool  : per-batch row sum of this HW tile (acc += when multi-step)
    final : o = pooled_sum @ w_fc + b_fc      (1/HW pre-folded into w_fc,
                                               proj dim zero-padded to 128 lanes)
    """
    tb, thw, k9 = patch_ref.shape

    # --- stem conv (im2col matmul) + folded BN + SiLU; bf16 in, f32 acc.
    # (tb, thw, k9) -> (tb*thw, k9): thw is sublane-aligned (or tb == 1), so
    # this leading-dim merge is layout-free and raises the MXU M-dim.
    x = patch_ref[...].reshape(tb * thw, k9)
    stem = jnp.dot(x, ws_ref[...], preferred_element_type=jnp.float32)
    stem = stem + bs_ref[...]
    stem = stem * jax.nn.sigmoid(stem)            # SiLU in f32 (v5e: no bf16 VPU/EUP)

    # --- head 1x1 conv + folded BN + SiLU; bf16 operands, f32 acc.
    head = jnp.dot(stem.astype(wh_ref.dtype), wh_ref[...],
                   preferred_element_type=jnp.float32)
    head = head + bh_ref[...]
    head = head * jax.nn.sigmoid(head)

    # --- partial global-average-pool sum, per batch element (VMEM only).
    part = head.reshape(tb, thw, -1).sum(axis=1)  # (TB, enc), f32

    def finalize(pooled_sum):
        # 1/HW already folded into w_fc; output lanes padded to 128.
        out = jnp.dot(pooled_sum.astype(wf_ref.dtype), wf_ref[...],
                      preferred_element_type=jnp.float32) + bf_ref[...]
        o_ref[...] = out.reshape(o_ref.shape).astype(o_ref.dtype)

    if single_step:
        # n_hw == 1: nothing to accumulate over -> no scratch, no pl.when.
        finalize(part)
    else:
        acc_ref, = maybe_acc
        h = pl.program_id(1)

        @pl.when(h == 0)
        def _():
            acc_ref[...] = jnp.zeros_like(acc_ref)

        acc_ref[...] += part

        # NOTE: correctness of this accumulator relies on the HW axis being the
        # innermost "arbitrary" grid axis (each batch block's full HW loop runs
        # sequentially on one core). Do not reorder the grid.
        @pl.when(h == pl.num_programs(1) - 1)
        def _():
            finalize(acc_ref[...])


# ----------------------------------------------------------------------------
# Glue: im2col, BN folding, tile pickers, parameter init, forward
# ----------------------------------------------------------------------------
def im2col_3x3_s2(x_nhwc):
    """3x3, stride-2, pad-1 patch extraction -> (B, Ho*Wo, 9*Cin)."""
    B, H, W, C = x_nhwc.shape
    Ho, Wo = H // 2, W // 2
    xp = jnp.pad(x_nhwc, ((0, 0), (1, 1), (1, 1), (0, 0)))
    cols = []
    for dy in range(3):
        for dx in range(3):
            cols.append(xp[:, dy:dy + 2 * Ho:2, dx:dx + 2 * Wo:2, :])
    patches = jnp.stack(cols, axis=3)            # (B, Ho, Wo, 9, C), order (dy, dx, c)
    return patches.reshape(B, Ho * Wo, 9 * C), (Ho, Wo)


def fold_bn(gamma, beta, mean, var, eps=1e-5):
    scale = gamma / jnp.sqrt(var + eps)
    bias = beta - mean * scale
    return scale, bias


def _pick_hw_tile(hw, want=2048):
    """Full HW when it fits; else largest multiple-of-16 divisor of hw <= want.

    16-row multiples keep bf16 sublane packing dense; the full-HW fallback uses
    the 'block equals the full dim' escape of the (8,128) BlockSpec rule, so odd
    Ho*Wo resolutions still lower correctly.
    """
    if hw <= want:
        return hw
    t = want - want % 16
    while t >= 16:
        if hw % t == 0:
            return t
        t -= 16
    # TODO(synk): no aligned divisor (prime-ish HW) -> whole per-image HW; for
    # extreme resolutions this would want a padded/masked HW tile instead.
    return hw


def _pick_batch_tile(b, thw, want=32, m_target=8192):
    """Batch tile TB: largest divisor of b that
       (a) leaves >= 2 grid steps on the parallel batch axis when b >= 2
           (both v7x TensorCores get work),
       (b) keeps the fused matmul M-dim tb*thw near m_target (bounds VMEM-held
           activations), and
       (c) is 1 when thw is not sublane-aligned (keeps in-kernel reshapes free).
    """
    if thw % 8 != 0:
        return 1
    cap = want if b < 2 else min(want, b // 2)
    cap = min(cap, max(1, m_target // thw))
    cap = max(cap, 1)
    for tb in range(cap, 0, -1):
        if b % tb == 0:
            return tb
    return 1


def init_params(key, cin=3, c_stem=16, encoded_dim=64, projection_dim=32):
    ks = jax.random.split(key, 8)
    p = {}
    # stem conv: PyTorch layout (Cout, Cin, kh, kw), bias=False
    p["stem_w"] = 0.1 * jax.random.normal(ks[0], (c_stem, cin, 3, 3), jnp.float32)
    p["stem_bn"] = (1.0 + 0.05 * jax.random.normal(ks[1], (c_stem,), jnp.float32),
                    0.05 * jax.random.normal(ks[2], (c_stem,), jnp.float32),
                    0.02 * jax.random.normal(ks[3], (c_stem,), jnp.float32),
                    jnp.abs(jax.random.normal(ks[4], (c_stem,), jnp.float32)) + 0.5)
    # head 1x1 conv: (encoded_dim, c_stem, 1, 1), bias=False
    p["head_w"] = 0.1 * jax.random.normal(ks[5], (encoded_dim, c_stem, 1, 1), jnp.float32)
    p["head_bn"] = (jnp.ones((encoded_dim,), jnp.float32),
                    jnp.zeros((encoded_dim,), jnp.float32),
                    jnp.zeros((encoded_dim,), jnp.float32),
                    jnp.ones((encoded_dim,), jnp.float32))
    # fc: Linear(encoded_dim, projection_dim) -> weight (proj, enc), bias (proj,)
    p["fc_w"] = 0.1 * jax.random.normal(ks[6], (projection_dim, encoded_dim), jnp.float32)
    p["fc_b"] = 0.01 * jax.random.normal(ks[7], (projection_dim,), jnp.float32)
    return p


def encoder_forward(params, images_nchw):
    B, Cin, H, W = images_nchw.shape
    x_nhwc = jnp.transpose(images_nchw, (0, 2, 3, 1)).astype(jnp.bfloat16)

    # im2col for the 3x3/s2 stem conv, built directly in bf16 (plain-JAX glue).
    # TODO(synk): for very large resolutions move im2col inside the kernel
    # (9 shifted pl.ds reads of an NHWC row block) to remove this HBM round trip.
    patches, (Ho, Wo) = im2col_3x3_s2(x_nhwc)              # (B, HW, 9*Cin) bf16
    HW = Ho * Wo
    K9 = patches.shape[-1]

    c_stem = params["stem_w"].shape[0]
    enc = params["head_w"].shape[0]
    proj = params["fc_w"].shape[0]
    proj_pad = max(128, ((proj + 127) // 128) * 128)       # lane-dense output

    # Fold BN scale into the conv weights; fold 1/HW into the FC weight;
    # zero-pad the projection dim to 128 lanes (one-time host-side transforms).
    s0, b0 = fold_bn(*params["stem_bn"])
    w_stem = jnp.transpose(params["stem_w"], (2, 3, 1, 0)).reshape(K9, c_stem)
    w_stem = (w_stem * s0[None, :]).astype(jnp.bfloat16)   # (9*Cin, c_stem)
    s1, b1 = fold_bn(*params["head_bn"])
    w_head = (params["head_w"][:, :, 0, 0].T * s1[None, :]).astype(jnp.bfloat16)
    w_fc = (params["fc_w"].T * (1.0 / HW)).astype(jnp.bfloat16)   # (enc, proj)
    w_fc = jnp.pad(w_fc, ((0, 0), (0, proj_pad - proj)))
    b_fc = jnp.pad(params["fc_b"], (0, proj_pad - proj)).reshape(1, proj_pad)
    b_fc = b_fc.astype(jnp.float32)

    b0 = b0.reshape(1, c_stem).astype(jnp.float32)
    b1 = b1.reshape(1, enc).astype(jnp.float32)

    thw = _pick_hw_tile(HW)
    n_hw = HW // thw
    tb = _pick_batch_tile(B, thw)
    n_b = B // tb
    single_step = (n_hw == 1)

    kernel = functools.partial(_encoder_fused_kernel, single_step=single_step)
    scratch = [] if single_step else [pltpu.VMEM((tb, enc), jnp.float32)]

    out = pl.pallas_call(
        kernel,
        out_shape=jax.ShapeDtypeStruct((B, 1, proj_pad), jnp.float32),
        grid_spec=pltpu.PrefetchScalarGridSpec(
            num_scalar_prefetch=0,
            grid=(n_b, n_hw),
            in_specs=[
                pl.BlockSpec((tb, thw, K9), lambda b, h: (b, h, 0)),
                pl.BlockSpec((K9, c_stem), lambda b, h: (0, 0)),
                pl.BlockSpec((1, c_stem), lambda b, h: (0, 0)),
                pl.BlockSpec((c_stem, enc), lambda b, h: (0, 0)),
                pl.BlockSpec((1, enc), lambda b, h: (0, 0)),
                pl.BlockSpec((enc, proj_pad), lambda b, h: (0, 0)),
                pl.BlockSpec((1, proj_pad), lambda b, h: (0, 0)),
            ],
            out_specs=pl.BlockSpec((tb, 1, proj_pad), lambda b, h: (b, 0, 0)),
            scratch_shapes=scratch,
        ),
        compiler_params=pltpu.CompilerParams(
            # batch axis parallel (>=2 steps when B>=2 -> both v7x TCs busy),
            # HW axis arbitrary (pool accumulator correctness).
            dimension_semantics=("parallel", "arbitrary"),
            # Guard rail: tiles here are far below every generation's budget
            # (32 MiB is also the scoped default on v6e/v7x, raises v5e's 16).
            vmem_limit_bytes=32 * 1024 * 1024),
    )(patches, w_stem, b0, w_head, b1, w_fc, b_fc)

    return out.reshape(B, proj_pad)[:, :proj]


# ----------------------------------------------------------------------------
# Pure-JAX reference (f32) for a tolerance check
# ----------------------------------------------------------------------------
def encoder_reference(params, images_nchw):
    x = jnp.transpose(images_nchw, (0, 2, 3, 1)).astype(jnp.float32)
    patches, _ = im2col_3x3_s2(x)                          # (B, HW, 9*Cin) f32
    K9 = patches.shape[-1]
    c_stem = params["stem_w"].shape[0]
    s0, b0 = fold_bn(*params["stem_bn"])
    w_stem = jnp.transpose(params["stem_w"], (2, 3, 1, 0)).reshape(K9, c_stem)
    stem = patches @ (w_stem * s0[None, :]) + b0
    stem = stem * jax.nn.sigmoid(stem)
    s1, b1 = fold_bn(*params["head_bn"])
    w_head = params["head_w"][:, :, 0, 0].T
    head = stem @ (w_head * s1[None, :]) + b1
    head = head * jax.nn.sigmoid(head)
    pooled = head.mean(axis=1)                             # (B, enc)
    return pooled @ params["fc_w"].T + params["fc_b"]


if __name__ == "__main__":
    key = jax.random.PRNGKey(0)
    k_img, k_par = jax.random.split(key)

    B, Cin, H, W = 2, 3, 32, 32
    encoded_dim, projection_dim = 64, 32

    images = jax.random.normal(k_img, (B, Cin, H, W), jnp.float32)
    params = init_params(k_par, cin=Cin, c_stem=16,
                         encoded_dim=encoded_dim, projection_dim=projection_dim)

    out = jax.jit(encoder_forward)(params, images)
    out = jax.block_until_ready(out)
    assert out.shape == (B, projection_dim), out.shape
    assert out.dtype == jnp.float32

    ref = encoder_reference(params, images)
    assert jnp.all(jnp.isfinite(out))
    assert jnp.allclose(out, ref, atol=3e-2, rtol=3e-2), (out, ref)

    print("KERNEL_OK")
</pallas_src>

<mosaic_0001>
module attributes {stable_mosaic.version = 11 : i64} {
  func.func @_encoder_fused_kernel(%arg0: i32, %arg1: i32, %arg2: memref<1x256x27xbf16, #tpu.memory_space<vmem>>, %arg3: memref<27x16xbf16, #tpu.memory_space<vmem>>, %arg4: memref<1x16xf32, #tpu.memory_space<vmem>>, %arg5: memref<16x64xbf16, #tpu.memory_space<vmem>>, %arg6: memref<1x64xf32, #tpu.memory_space<vmem>>, %arg7: memref<64x128xbf16, #tpu.memory_space<vmem>>, %arg8: memref<1x128xf32, #tpu.memory_space<vmem>>, %arg9: memref<1x1x128xf32, #tpu.memory_space<vmem>>) attributes {dimension_semantics = [#tpu.dimension_semantics<parallel>, #tpu.dimension_semantics<arbitrary>], iteration_bounds = array<i64: 2, 1>, scalar_prefetch = 0 : i64, scratch_operands = 0 : i64, tpu.core_type = #tpu.core_type<tc>, window_params = [{transform_indices = @transform_0, window_bounds = array<i64: 1, 256, 27>}, {pipeline_mode = #tpu.pipeline_mode<synchronous>, transform_indices = @transform_1, window_bounds = array<i64: 27, 16>}, {pipeline_mode = #tpu.pipeline_mode<synchronous>, transform_indices = @transform_2, window_bounds = array<i64: 1, 16>}, {pipeline_mode = #tpu.pipeline_mode<synchronous>, transform_indices = @transform_3, window_bounds = array<i64: 16, 64>}, {pipeline_mode = #tpu.pipeline_mode<synchronous>, transform_indices = @transform_4, window_bounds = array<i64: 1, 64>}, {pipeline_mode = #tpu.pipeline_mode<synchronous>, transform_indices = @transform_5, window_bounds = array<i64: 64, 128>}, {pipeline_mode = #tpu.pipeline_mode<synchronous>, transform_indices = @transform_6, window_bounds = array<i64: 1, 128>}, {transform_indices = @transform_7, window_bounds = array<i64: 1, 1, 128>}]} {
    %c0 = arith.constant 0 : index
    %c0_0 = arith.constant 0 : index
    %c0_1 = arith.constant 0 : index
    %0 = vector.load %arg2[%c0, %c0_0, %c0_1] : memref<1x256x27xbf16, #tpu.memory_space<vmem>>, vector<1x256x27xbf16>
    %1 = vector.shape_cast %0 : vector<1x256x27xbf16> to vector<256x27xbf16>
    %c0_2 = arith.constant 0 : index
    %c0_3 = arith.constant 0 : index
    %2 = vector.load %arg3[%c0_2, %c0_3] : memref<27x16xbf16, #tpu.memory_space<vmem>>, vector<27x16xbf16>
    %cst = arith.constant dense<0.000000e+00> : vector<256x16xf32>
    %3 = tpu.matmul %1, %2, %cst {dimension_numbers = #tpu.dot_dimension_numbers<[1], [0], [0], [1], [0, 0, 1, 1], [], []>} : vector<256x27xbf16>, vector<27x16xbf16>, vector<256x16xf32> -> vector<256x16xf32>
    %c0_4 = arith.constant 0 : index
    %c0_5 = arith.constant 0 : index
    %4 = vector.load %arg4[%c0_4, %c0_5] : memref<1x16xf32, #tpu.memory_space<vmem>>, vector<1x16xf32>
    %5 = vector.broadcast %4 : vector<1x16xf32> to vector<256x16xf32>
    %6 = arith.addf %3, %5 : vector<256x16xf32>
    %7 = arith.negf %6 : vector<256x16xf32>
    %8 = math.exp %7 : vector<256x16xf32>
    %cst_6 = arith.constant 1.000000e+00 : f32
    %9 = vector.broadcast %cst_6 : f32 to vector<256x16xf32>
    %10 = arith.addf %9, %8 : vector<256x16xf32>
    %11 = arith.divf %9, %10 : vector<256x16xf32>
    %12 = arith.mulf %6, %11 : vector<256x16xf32>
    %13 = arith.truncf %12 : vector<256x16xf32> to vector<256x16xbf16>
    %c0_7 = arith.constant 0 : index
    %c0_8 = arith.constant 0 : index
    %14 = vector.load %arg5[%c0_7, %c0_8] : memref<16x64xbf16, #tpu.memory_space<vmem>>, vector<16x64xbf16>
    %cst_9 = arith.constant dense<0.000000e+00> : vector<256x64xf32>
    %15 = tpu.matmul %13, %14, %cst_9 {dimension_numbers = #tpu.dot_dimension_numbers<[1], [0], [0], [1], [0, 0, 1, 1], [], []>} : vector<256x16xbf16>, vector<16x64xbf16>, vector<256x64xf32> -> vector<256x64xf32>
    %c0_10 = arith.constant 0 : index
    %c0_11 = arith.constant 0 : index
    %16 = vector.load %arg6[%c0_10, %c0_11] : memref<1x64xf32, #tpu.memory_space<vmem>>, vector<1x64xf32>
    %17 = vector.broadcast %16 : vector<1x64xf32> to vector<256x64xf32>
    %18 = arith.addf %15, %17 : vector<256x64xf32>
    %19 = arith.negf %18 : vector<256x64xf32>
    %20 = math.exp %19 : vector<256x64xf32>
    %cst_12 = arith.constant 1.000000e+00 : f32
    %21 = vector.broadcast %cst_12 : f32 to vector<256x64xf32>
    %22 = arith.addf %21, %20 : vector<256x64xf32>
    %23 = arith.divf %21, %22 : vector<256x64xf32>
    %24 = arith.mulf %18, %23 : vector<256x64xf32>
    %25 = vector.shape_cast %24 : vector<256x64xf32> to vector<1x256x64xf32>
    %cst_13 = arith.constant dense<0.000000e+00> : vector<1x64xf32>
    %26 = vector.multi_reduction <add>, %25, %cst_13 [1] : vector<1x256x64xf32> to vector<1x64xf32>
    %27 = arith.truncf %26 : vector<1x64xf32> to vector<1x64xbf16>
    %c0_14 = arith.constant 0 : index
    %c0_15 = arith.constant 0 : index
    %28 = vector.load %arg7[%c0_14, %c0_15] : memref<64x128xbf16, #tpu.memory_space<vmem>>, vector<64x128xbf16>
    %cst_16 = arith.constant dense<0.000000e+00> : vector<1x128xf32>
    %29 = tpu.matmul %27, %28, %cst_16 {dimension_numbers = #tpu.dot_dimension_numbers<[1], [0], [0], [1], [0, 0, 1, 1], [], []>} : vector<1x64xbf16>, vector<64x128xbf16>, vector<1x128xf32> -> vector<1x128xf32>
    %c0_17 = arith.constant 0 : index
    %c0_18 = arith.constant 0 : index
    %30 = vector.load %arg8[%c0_17, %c0_18] : memref<1x128xf32, #tpu.memory_space<vmem>>, vector<1x128xf32>
    %31 = arith.addf %29, %30 : vector<1x128xf32>
    %32 = vector.shape_cast %31 : vector<1x128xf32> to vector<1x1x128xf32>
    %c0_19 = arith.constant 0 : index
    %c0_20 = arith.constant 0 : index
    %c0_21 = arith.constant 0 : index
    %33 = vector.load %arg9[%c0_19, %c0_20, %c0_21] : memref<1x1x128xf32, #tpu.memory_space<vmem>>, vector<1x1x128xf32>
    tpu.vector_store %arg9[%c0_19, %c0_20, %c0_21], %32 {strides = array<i32>} : memref<1x1x128xf32, #tpu.memory_space<vmem>>, vector<1x1x128xf32>,
    return
  }
  func.func @transform_0(%arg0: i32, %arg1: i32) -> (i32, i32, i32) {
    %c0_i32 = arith.constant 0 : i32
    %c0_i32_0 = arith.constant 0 : i32
    return %arg0, %arg1, %c0_i32 : i32, i32, i32
  }
  func.func @transform_1(%arg0: i32, %arg1: i32) -> (i32, i32) {
    %c0_i32 = arith.constant 0 : i32
    %c0_i32_0 = arith.constant 0 : i32
    %c0_i32_1 = arith.constant 0 : i32
    return %c0_i32, %c0_i32_0 : i32, i32
  }
  func.func @transform_2(%arg0: i32, %arg1: i32) -> (i32, i32) {
    %c0_i32 = arith.constant 0 : i32
    %c0_i32_0 = arith.constant 0 : i32
    %c0_i32_1 = arith.constant 0 : i32
    return %c0_i32, %c0_i32_0 : i32, i32
  }
  func.func @transform_3(%arg0: i32, %arg1: i32) -> (i32, i32) {
    %c0_i32 = arith.constant 0 : i32
    %c0_i32_0 = arith.constant 0 : i32
    %c0_i32_1 = arith.constant 0 : i32
    return %c0_i32, %c0_i32_0 : i32, i32
  }
  func.func @transform_4(%arg0: i32, %arg1: i32) -> (i32, i32) {
    %c0_i32 = arith.constant 0 : i32
    %c0_i32_0 = arith.constant 0 : i32
    %c0_i32_1 = arith.constant 0 : i32
    return %c0_i32, %c0_i32_0 : i32, i32
  }
  func.func @transform_5(%arg0: i32, %arg1: i32) -> (i32, i32) {
    %c0_i32 = arith.constant 0 : i32
    %c0_i32_0 = arith.constant 0 : i32
    %c0_i32_1 = arith.constant 0 : i32
    return %c0_i32, %c0_i32_0 : i32, i32
  }
  func.func @transform_6(%arg0: i32, %arg1: i32) -> (i32, i32) {
    %c0_i32 = arith.constant 0 : i32
    %c0_i32_0 = arith.constant 0 : i32
    %c0_i32_1 = arith.constant 0 : i32
    return %c0_i32, %c0_i32_0 : i32, i32
  }
  func.func @transform_7(%arg0: i32, %arg1: i32) -> (i32, i32, i32) {
    %c0_i32 = arith.constant 0 : i32
    %c0_i32_0 = arith.constant 0 : i32
    %c0_i32_1 = arith.constant 0 : i32
    return %arg0, %c0_i32, %c0_i32_0 : i32, i32, i32
  }
}

</mosaic_0001>

<bundles_post_ra>
// kernel: encoder_forward.1
= control target key start
LH: loop header
LB: loop body
LE: loop exit
PB: predicated region body
PF: predicated region fallthrough
CT: control target
= control target key end

     0   :  { %12 = vsyncpa [#allocation3], 0  ;;  %s2840_s0 = inlined_call_operand.vmem [shape: bf16[2,256,27], index: 0, kind: input, shape index: {}]   ;;  %s2841_s1 = inlined_call_operand.vmem [shape: bf16[27,16], index: 1, kind: input, shape index: {}]   ;;  %s2842_s2 = inlined_call_operand.vmem [shape: f32[1,16], index: 2, kind: input, shape index: {}]   ;;  %s2843_s3 = inlined_call_operand.vmem [shape: bf16[16,64], index: 3, kind: input, shape index: {}]   ;;  %s2844_s4 = inlined_call_operand.vmem [shape: f32[1,64], index: 4, kind: input, shape index: {}]   ;;  %s2845_s5 = inlined_call_operand.vmem [shape: bf16[64,128], index: 5, kind: input, shape index: {}]   ;;  %s2846_s6 = inlined_call_operand.vmem [shape: f32[1,128], index: 6, kind: input, shape index: {}]   ;;  %s2847_s7 = inlined_call_operand.hbm [shape: f32[2,1,128], index: 7, kind: output, shape index: {}]  }
   0x1   :  { %14 = vsyncpa [#allocation3 + $0x1], 0  ;;  %s2291_s24 = smov 0   ;;  %s2293_s25 = smov 0  }
   0x2   :  { %s2295_s26 = smov 0   ;;  %s2297_s27 = smov 0  }
   0x3   :  { %s2299_s28 = smov 0   ;;  %s2301_s29 = smov 0  }
   0x4 LB: > { %s1575_s30 = sadd.s32 4294967295, %s2245_s29   ;;  %s1576_s8 = sadd.s32 4294967294, %s2245_s29   ;;  %s2245_s29 = sphi %s2301_s29, %s20_s29   ;;  %s2241_s28 = sphi %s2299_s28, %s2854_s28   ;;  %s2237_s27 = sphi %s2297_s27, %s2853_s27   ;;  %s2233_s26 = sphi %s2295_s26, %s2852_s26   ;;  %s2229_s25 = sphi %s2293_s25, %s2851_s25   ;;  %s2225_s24 = sphi %s2291_s24, %s2850_s24  }
   0x5   : > { %s32_s9 = sadd.s32 1, %s2241_s28  ;;  %s193_s10 = sadd.s32 1, %s2233_s26 }
   0x6   : > { %p34_p0 = scmp.ge.s32.totalorder %s32_s9, 2  ;;  %p203_p1 = scmp.ne.s32.totalorder %s2233_s26, %s2229_s25 }
   0x7   : > { %p204_p2 = scmp.eq.s32.totalorder %s1575_s30, 1  ;;  %p209_p3 = scmp.ne.s32.totalorder %s2229_s25, %s2225_s24 }
   0x8   : > { %s2856_s9 = smov (%p34_p0, %s32_s9), 0  ;;  %p210_p5 = scmp.eq.s32.totalorder %s1576_s8, 1 }
   0x9   : > { %p2331_p4 = por %p204_p2, %p203_p1  ;;  %s190_s12 = ssub.s32 %s2241_s28, %s2856_s9 }
   0xa   : > { %p1579_p6 = scmp.ge.s32.totalorder %s2245_s29, 1  ;;  %p191_p7 = scmp.eq.s32.totalorder %s190_s12, 0 }
   0xb   : > { %p2338_p8 = por %p210_p5, %p209_p3  ;;  %p259_p9 = scmp.lt.s32.totalorder %s2245_s29, 3 }
   0xc   : > { %s2344_s14 = scalar_select %p191_p7, %s2233_s26, %s193_s10  }
   0xd   : > { %p260_p10 = pnand %p1579_p6, %p259_p9 }
   0xe   : > { %v1888_v0 = vld [vmem:[%s2841_s1] sm:$0xff] (!%p260_p10)   ;;  %vm488_vm0 = vcmask (!%p260_p10), 1044480   ;;  %v1889_v1 = vld [vmem:[%s2841_s1 + $0x8] sm:$0x3f] (!%p260_p10)   ;;  %vm489_vm1 = vcmask (!%p260_p10), 1045504   ;;  %p295_p11 = scmp.lt.s32.totalorder (!%p260_p10), %s2237_s27, 1 }
   0xf   : > { %263 = sbr.rel (%p260_p10) target bundleno = 834 (0x342), region = 48  ;;  %1748 = vmatprep.subr.bf16.mxu0 (!%p260_p10), %v1888_v0  ;;  %v2247_v2 = vmov (!%p260_p10), 65535   ;;  %vm439_vm2 = vcmask (!%p260_p10), 220160   ;;  %v1906_v22 = vld [vmem:[%s2843_s3] sm:$0xff] (!%p260_p10)   ;;  %vm911_vm3 = vcmask (!%p260_p10), 130048   ;;  %vm2249_vm4 = vmmov (!%p260_p10), 0  }
  0x10   : > { %1749 = vmatpush3.bf16.msra.mxu0 (!%p260_p10), %v1888_v0  ;;  %v490_v3 = vsel (!%p260_p10), %vm488_vm0, 4294967295, %v2247_v2  ;;  %1784 = vmatprep.subr.bf16.mxu1 (!%p260_p10), %v1906_v22  ;;  %v2397_v23 = vld [vmem:[%s2842_s2] ss:$0 sm:$0xff] (!%p260_p10)  ;;  %vm1345_vm5 = vcmask (!%p260_p10), 523264   ;;  %s292_s8 = sand.u32 (!%p260_p10), 1, %s2229_s25   ;;  %s1704_s15 = sshll.u32 (!%p260_p10), %s2237_s27, 4 }
  0x11   : > { %v491_v4 = vsel (!%p260_p10), %vm489_vm1, %v490_v3, 0  ;;  %1785 = vmatpush3.bf16.msra.mxu1 (!%p260_p10), %v1906_v22  ;;  %s293_s16 = scalar_lea.vmem (!%p260_p10), [#allocation2], %s292_s8  ;;  %s1494_s21 = scalar_lea.sflag (!%p260_p10), [#allocation3], %s292_s8 }
  0x12   : > { %v493_v5 = vand.u32 (!%p260_p10), %v1889_v1, %v491_v4  ;;  %s1506_s17 = sshll.u32 (!%p260_p10), %s293_s16, 4  ;;  %s2250_s22 = smov (!%p260_p10), [#allocation2]   ;;  %s2795_s17 = int_to_ptr.vmem [resolvable:$true] %s1506_s17 }
  0x14   : > { %1750 = vmatprep.subr.bf16.mxu0 (!%p260_p10), %v493_v5 }
  0x15   : > { %1751 = vmatpush3.bf16.msra.mxu0 (!%p260_p10), %v493_v5 }
  0x16   : > { %s296_s19 = scalar_select %p295_p11, %s2237_s27, 1 }
  0x17   : > { %s2167_s27 = scalar_lea.vmem %s2795_s17, 16 }
  0x18   : > { %s1707_s20 = sshll.u32 %s296_s19, 7  ;;  %p2168_p12 = scmp.ne.s32.totalorder %s2795_s17, %s2167_s27 }
  0x19   : > { %s2357_s23 = scalar_lea.vmem %s2840_s0, %s1707_s20  ;;  %s2793_s20 = scalar_lea.hbm %s2847_s7, %s1704_s15 }
  0x1a   : > { %v1890_v6 = vld [vmem:[%s2357_s23] sm:$0xff]   ;;  %v1891_v7 = vld [vmem:[%s2357_s23 + $0x8] sm:$0xff]   ;;  %v1892_v8 = vld [vmem:[%s2357_s23 + $0x10] sm:$0xff]   ;;  %p2169_p13 = pnand %p2168_p12, %p2331_p4 }
  0x1b   : > { %1752 = vmatprep.mubr.msk.bf16.mxu0 %vm439_vm2, %v1890_v6  ;;  %v1893_v9 = vld [vmem:[%s2357_s23 + $0x18] sm:$0xff]   ;;  %v1894_v10 = vld [vmem:[%s2357_s23 + $0x20] sm:$0xff]   ;;  %v1895_v11 = vld [vmem:[%s2357_s23 + $0x28] sm:$0xff]  }
  0x1c   : > { %1753 = vmatmul.mubr.msk.bf16.vlgmr.msra.gmra.mrb[0].mxu0 %vm439_vm2, %v1891_v7  ;;  %v1896_v12 = vld [vmem:[%s2357_s23 + $0x30] sm:$0xff]   ;;  %v1897_v13 = vld [vmem:[%s2357_s23 + $0x38] sm:$0xff]   ;;  %v1898_v14 = vld [vmem:[%s2357_s23 + $0x40] sm:$0xff]   ;;  %p2170_p0 = pneg %p2169_p13 }
  0x1d   : > { %1756 = vmatprep.mubr.msk.bf16.mxu0 %vm439_vm2, %v1892_v8  ;;  %v1899_v15 = vld [vmem:[%s2357_s23 + $0x48] sm:$0xff]   ;;  %v1900_v16 = vld [vmem:[%s2357_s23 + $0x50] sm:$0xff]   ;;  %v1901_v17 = vld [vmem:[%s2357_s23 + $0x58] sm:$0xff]  }
  0x1e   : > { %v1902_v18 = vld [vmem:[%s2357_s23 + $0x60] sm:$0xff]   ;;  %v1903_v19 = vld [vmem:[%s2357_s23 + $0x68] sm:$0xff]   ;;  %v1904_v20 = vld [vmem:[%s2357_s23 + $0x70] sm:$0xff]  }
  0x1f   : > { %v1905_v21 = vld [vmem:[%s2357_s23 + $0x78] sm:$0xff]   ;;  %s2171_s23 = sshll.u32 %s2250_s22, 4  ;;  %s2172_s23 = int_to_ptr.vmem [resolvable:$false] %s2171_s23 }
  0x20   : > { %s2173_s30 = scalar_lea.vmem %s2172_s23, 32  ;;  %p2174_p1 = scmp.lt.s32.totalorder %s2795_s17, %s2172_s23 }
  0x21   : > { %p2175_p2 = scmp.lt.s32.totalorder %s2173_s30, %s2167_s27 }
  0x23   : > { %p2176_p3 = por %p2175_p2, %p2174_p1 }
  0x24   : > { %1757 = vmatmul.mubr.msk.bf16.gmra.mrb[4].mxu0 %vm439_vm2, %v1893_v9 }
  0x25   : > { %1760 = vmatprep.mubr.msk.bf16.mxu0 %vm439_vm2, %v1894_v10  ;;  %p2177_p5 = pnand %p2176_p3, %p2170_p0 }
  0x2c   : > { %1761 = vmatmul.mubr.msk.bf16.gmra.mrb[8].mxu0 %vm439_vm2, %v1895_v11 }
  0x2d   : > { %1764 = vmatprep.mubr.msk.bf16.mxu0 %vm439_vm2, %v1896_v12 }
  0x34   : > { %1765 = vmatmul.mubr.msk.bf16.gmra.mrb[12].mxu0 %vm439_vm2, %v1897_v13 }
  0x35   : > { %1768 = vmatprep.mubr.msk.bf16.mxu0 %vm439_vm2, %v1898_v14 }
  0x3c   : > { %1769 = vmatmul.mubr.msk.bf16.gmra.mrb[16].mxu0 %vm439_vm2, %v1899_v15 }
  0x3d   : > { %1772 = vmatprep.mubr.msk.bf16.mxu0 %vm439_vm2, %v1900_v16 }
  0x44   : > { %1773 = vmatmul.mubr.msk.bf16.gmra.mrb[20].mxu0 %vm439_vm2, %v1901_v17 }
  0x45   : > { %1776 = vmatprep.mubr.msk.bf16.mxu0 %vm439_vm2, %v1902_v18 }
  0x4c   : > { %1777 = vmatmul.mubr.msk.bf16.gmra.mrb[24].mxu0 %vm439_vm2, %v1903_v19 }
  0x4d   : > { %1780 = vmatprep.mubr.msk.bf16.mxu0 %vm439_vm2, %v1904_v20 }
  0x54   : > { %1781 = vmatmul.mubr.msk.bf16.gmra.mrb[28].mxu0 %vm439_vm2, %v1905_v21 }
  0xef   : > { %v1754_v24 = vpop.f32.mrb[0].mxu0 }
  0xf0   : > { %v2400_v25 = vadd.f32 %v1754_v24, %v2397_v23  ;;  %v529_v26 = vpop.f32.mrb[1].mxu0 }
  0xf1   : > { %v2403_v27 = vadd.f32 %v2397_v23, %v529_v26  ;;  %v1755_v28 = vpop.f32.mrb[2].mxu0 }
  0xf2   : > { %v1619_v29 = vmul.f32 -1.442695, %v2400_v25  ;;  %v2407_v30 = vadd.f32 %v1755_v28, %v2397_v23  ;;  %v532_v31 = vpop.f32.mrb[3].mxu0 }
  0xf3   : > { %v1617_v32 = vmul.f32 -1.442695, %v2403_v27  ;;  %v2411_v33 = vadd.f32 %v2397_v23, %v532_v31 }
  0xf4   : > { %1911 = vpow2.f32 %v1619_v29  ;;  %v1620_v34 = vmul.f32 -1.442695, %v2407_v30 }
  0xf5   : > { %1913 = vpow2.f32 %v1617_v32  ;;  %v1618_v35 = vmul.f32 -1.442695, %v2411_v33 }
  0xf6   : > { %1915 = vpow2.f32 %v1620_v34 }
  0xf7   : > { %1917 = vpow2.f32 %v1618_v35  ;;  %v1758_v36 = vpop.f32.mrb[4].mxu0 }
  0xf8   : > { %v2416_v37 = vadd.f32 %v1758_v36, %v2397_v23  ;;  %v545_v38 = vpop.f32.mrb[5].mxu0 }
  0xf9   : > { %v2419_v39 = vadd.f32 %v2397_v23, %v545_v38  ;;  %v1759_v40 = vpop.f32.mrb[6].mxu0 }
  0xfa   : > { %v1623_v41 = vmul.f32 -1.442695, %v2416_v37  ;;  %v2423_v42 = vadd.f32 %v1759_v40, %v2397_v23  ;;  %v548_v43 = vpop.f32.mrb[7].mxu0 }
  0xfb   : > { %v1621_v44 = vmul.f32 -1.442695, %v2419_v39  ;;  %v2427_v45 = vadd.f32 %v2397_v23, %v548_v43 }
  0xfc   : > { %1919 = vpow2.f32 %v1623_v41  ;;  %v1624_v46 = vmul.f32 -1.442695, %v2423_v42 }
  0xfd   : > { %1921 = vpow2.f32 %v1621_v44  ;;  %v1622_v47 = vmul.f32 -1.442695, %v2427_v45 }
  0xfe   : > { %v1912_v48 = vpop.eup %1911  ;;  %1923 = vpow2.f32 %v1624_v46 }
  0xff   : > { %v1914_v49 = vpop.eup %1913  ;;  %v754_v50 = vadd.f32 1.0, %v1912_v48  ;;  %1925 = vpow2.f32 %v1622_v47  ;;  %v1762_v51 = vpop.f32.mrb[8].mxu0 }
 0x100   : > { %v1916_v52 = vpop.eup %1915  ;;  %v752_v53 = vadd.f32 1.0, %v1914_v49  ;;  %v2432_v54 = vadd.f32 %v1762_v51, %v2397_v23  ;;  %v561_v55 = vpop.f32.mrb[9].mxu0 }
 0x101   : > { %v1918_v56 = vpop.eup %1917  ;;  %1927 = vrcp.f32 %v754_v50  ;;  %v755_v57 = vadd.f32 1.0, %v1916_v52  ;;  %v2435_v58 = vadd.f32 %v2397_v23, %v561_v55  ;;  %v1763_v59 = vpop.f32.mrb[10].mxu0 }
 0x102   : > { %1929 = vrcp.f32 %v752_v53  ;;  %v753_v60 = vadd.f32 1.0, %v1918_v56  ;;  %v1627_v61 = vmul.f32 -1.442695, %v2432_v54  ;;  %v2439_v62 = vadd.f32 %v1763_v59, %v2397_v23  ;;  %v564_v63 = vpop.f32.mrb[11].mxu0 }
 0x103   : > { %1931 = vrcp.f32 %v755_v57  ;;  %v1625_v0 = vmul.f32 -1.442695, %v2435_v58  ;;  %v2443_v1 = vadd.f32 %v2397_v23, %v564_v63 }
 0x104   : > { %1933 = vrcp.f32 %v753_v60  ;;  %v1628_v2 = vmul.f32 -1.442695, %v2439_v62 }
 0x105   : > { %1935 = vpow2.f32 %v1627_v61  ;;  %v1626_v3 = vmul.f32 -1.442695, %v2443_v1 }
 0x106   : > { %v1920_v4 = vpop.eup %1919  ;;  %1937 = vpow2.f32 %v1625_v0 }
 0x107   : > { %v1922_v5 = vpop.eup %1921  ;;  %v758_v6 = vadd.f32 1.0, %v1920_v4  ;;  %1939 = vpow2.f32 %v1628_v2  ;;  %v1766_v7 = vpop.f32.mrb[12].mxu0 }
 0x108   : > { %v1924_v8 = vpop.eup %1923  ;;  %v756_v9 = vadd.f32 1.0, %v1922_v5  ;;  %1941 = vpow2.f32 %v1626_v3  ;;  %v2448_v10 = vadd.f32 %v1766_v7, %v2397_v23  ;;  %v577_v11 = vpop.f32.mrb[13].mxu0 }
 0x109   : > { %v1926_v12 = vpop.eup %1925  ;;  %1943 = vrcp.f32 %v758_v6  ;;  %v759_v13 = vadd.f32 1.0, %v1924_v8  ;;  %v2451_v14 = vadd.f32 %v2397_v23, %v577_v11  ;;  %v1767_v15 = vpop.f32.mrb[14].mxu0 }
 0x10a   : > { %1945 = vrcp.f32 %v756_v9  ;;  %v757_v16 = vadd.f32 1.0, %v1926_v12  ;;  %v1631_v17 = vmul.f32 -1.442695, %v2448_v10  ;;  %v2455_v18 = vadd.f32 %v1767_v15, %v2397_v23  ;;  %v580_v19 = vpop.f32.mrb[15].mxu0 }
 0x10b   : > { %v1928_v20 = vpop.eup %1927  ;;  %1947 = vrcp.f32 %v759_v13  ;;  %v1629_v21 = vmul.f32 -1.442695, %v2451_v14  ;;  %v2459_v22 = vadd.f32 %v2397_v23, %v580_v19 }
 0x10c   : > { %v1930_v24 = vpop.eup %1929  ;;  %1949 = vrcp.f32 %v757_v16  ;;  %v1632_v26 = vmul.f32 -1.442695, %v2455_v18  ;;  %v850_v32 = vmul.f32 %v1928_v20, %v2400_v25 }
 0x10d   : > { %v1932_v28 = vpop.eup %1931  ;;  %1951 = vpow2.f32 %v1631_v17  ;;  %v1630_v29 = vmul.f32 -1.442695, %v2459_v22  ;;  %v848_v36 = vmul.f32 %v1930_v24, %v2403_v27 }
 0x10e   : > { %v1934_v31 = vpop.eup %1933  ;;  %v851_v34 = vmul.f32 %v1932_v28, %v2407_v30  ;;  %1953 = vpow2.f32 %v1629_v21 }
 0x10f   : > { %v1936_v35 = vpop.eup %1935  ;;  %v849_v38 = vmul.f32 %v1934_v31, %v2411_v33  ;;  %1955 = vpow2.f32 %v1632_v26  ;;  %v1770_v40 = vpop.f32.mrb[16].mxu0 }
 0x110   : > { %v1938_v41 = vpop.eup %1937  ;;  %v881_v43 = vpack.c.bf16 %v851_v34, %v850_v32  ;;  %v762_v44 = vadd.f32 1.0, %v1936_v35  ;;  %1957 = vpow2.f32 %v1630_v29  ;;  %v2468_v46 = vadd.f32 %v1770_v40, %v2397_v23  ;;  %v593_v47 = vpop.f32.mrb[17].mxu0 }
 0x111   : > { %v1940_v25 = vpop.eup %1939  ;;  %v760_v48 = vadd.f32 1.0, %v1938_v41  ;;  %v2471_v30 = vadd.f32 %v2397_v23, %v593_v47  ;;  %v1771_v49 = vpop.f32.mrb[18].mxu0  ;;  %v880_v27 = vpack.c.bf16 %v849_v38, %v848_v36 }
 0x112   : > { %v1942_v50 = vpop.eup %1941  ;;  %1959 = vrcp.f32 %v762_v44  ;;  %v763_v33 = vadd.f32 1.0, %v1940_v25  ;;  %v1635_v51 = vmul.f32 -1.442695, %v2468_v46  ;;  %v2475_v52 = vadd.f32 %v1771_v49, %v2397_v23  ;;  %v596_v53 = vpop.f32.mrb[19].mxu0 }
 0x113   : > { %v1944_v55 = vpop.eup %1943  ;;  %1961 = vrcp.f32 %v760_v48  ;;  %v761_v56 = vadd.f32 1.0, %v1942_v50  ;;  %v1633_v57 = vmul.f32 -1.442695, %v2471_v30  ;;  %v2479_v59 = vadd.f32 %v2397_v23, %v596_v53  ;;  %1786 = vmatprep.mubr.msk.bf16.mxu1 %vm911_vm3, %v880_v27 }
 0x114   : > { %v1946_v60 = vpop.eup %1945  ;;  %1963 = vrcp.f32 %v763_v33  ;;  %v1636_v61 = vmul.f32 -1.442695, %v2475_v52  ;;  %1787 = vmatmul.mubr.msk.bf16.vlgmr.msra.gmra.mrb[0].mxu1 %vm911_vm3, %v881_v43  ;;  %v854_v3 = vmul.f32 %v1944_v55, %v2416_v37 }
 0x115   : > { %v1948_v63 = vpop.eup %1947  ;;  %1965 = vrcp.f32 %v761_v56  ;;  %v1634_v0 = vmul.f32 -1.442695, %v2479_v59  ;;  %v852_v6 = vmul.f32 %v1946_v60, %v2419_v39 }
 0x116   : > { %v1950_v2 = vpop.eup %1949  ;;  %v855_v4 = vmul.f32 %v1948_v63, %v2423_v42  ;;  %1967 = vpow2.f32 %v1635_v51 }
 0x117   : > { %v1952_v5 = vpop.eup %1951  ;;  %v853_v7 = vmul.f32 %v1950_v2, %v2427_v45  ;;  %1969 = vpow2.f32 %v1633_v57  ;;  %v1774_v8 = vpop.f32.mrb[20].mxu0 }
 0x118   : > { %v1954_v9 = vpop.eup %1953  ;;  %v883_v11 = vpack.c.bf16 %v855_v4, %v854_v3  ;;  %v766_v12 = vadd.f32 1.0, %v1952_v5  ;;  %1971 = vpow2.f32 %v1636_v61  ;;  %v2490_v13 = vadd.f32 %v1774_v8, %v2397_v23  ;;  %v609_v15 = vpop.f32.mrb[21].mxu0 }
 0x119   : > { %v1956_v16 = vpop.eup %1955  ;;  %v882_v37 = vpack.c.bf16 %v853_v7, %v852_v6  ;;  %v764_v17 = vadd.f32 1.0, %v1954_v9  ;;  %1973 = vpow2.f32 %v1634_v0  ;;  %v2493_v42 = vadd.f32 %v2397_v23, %v609_v15  ;;  %v1775_v39 = vpop.f32.mrb[22].mxu0 }
 0x11a   : > { %v1958_v19 = vpop.eup %1957  ;;  %1975 = vrcp.f32 %v766_v12  ;;  %v767_v45 = vadd.f32 1.0, %v1956_v16  ;;  %v1639_v20 = vmul.f32 -1.442695, %v2490_v13  ;;  %v2497_v21 = vadd.f32 %v1775_v39, %v2397_v23  ;;  %v612_v24 = vpop.f32.mrb[23].mxu0 }
 0x11b   : > { %1977 = vrcp.f32 %v764_v17  ;;  %v765_v26 = vadd.f32 1.0, %v1958_v19  ;;  %v1637_v28 = vmul.f32 -1.442695, %v2493_v42  ;;  %v2501_v29 = vadd.f32 %v2397_v23, %v612_v24  ;;  %1790 = vmatprep.mubr.msk.bf16.mxu1 %vm911_vm3, %v882_v37 }
 0x11c   : > { %v1960_v31 = vpop.eup %1959  ;;  %1979 = vrcp.f32 %v767_v45  ;;  %v1640_v32 = vmul.f32 -1.442695, %v2497_v21  ;;  %1791 = vmatmul.mubr.msk.bf16.gmra.mrb[4].mxu1 %vm911_vm3, %v883_v11 }
 0x11d   : > { %v1962_v34 = vpop.eup %1961  ;;  %1981 = vrcp.f32 %v765_v26  ;;  %v1638_v35 = vmul.f32 -1.442695, %v2501_v29  ;;  %v858_v40 = vmul.f32 %v1960_v31, %v2432_v54 }
 0x11e   : > { %v1964_v36 = vpop.eup %1963  ;;  %1983 = vpow2.f32 %v1639_v20  ;;  %v856_v47 = vmul.f32 %v1962_v34, %v2435_v58 }
 0x11f   : > { %v1966_v38 = vpop.eup %1965  ;;  %v859_v41 = vmul.f32 %v1964_v36, %v2439_v62  ;;  %1985 = vpow2.f32 %v1637_v28  ;;  %v1778_v43 = vpop.f32.mrb[24].mxu0 }
 0x120   : > { %v1968_v44 = vpop.eup %1967  ;;  %v857_v25 = vmul.f32 %v1966_v38, %v2443_v1  ;;  %1987 = vpow2.f32 %v1640_v32  ;;  %v2512_v48 = vadd.f32 %v1778_v43, %v2397_v23  ;;  %v625_v49 = vpop.f32.mrb[25].mxu0 }
 0x121   : > { %v1970_v27 = vpop.eup %1969  ;;  %v885_v50 = vpack.c.bf16 %v859_v41, %v858_v40  ;;  %v770_v33 = vadd.f32 1.0, %v1968_v44  ;;  %1989 = vpow2.f32 %v1638_v35  ;;  %v2515_v54 = vadd.f32 %v2397_v23, %v625_v49  ;;  %v1779_v62 = vpop.f32.mrb[26].mxu0 }
 0x122   : > { %v1972_v51 = vpop.eup %1971  ;;  %v884_v53 = vpack.c.bf16 %v857_v25, %v856_v47  ;;  %v768_v55 = vadd.f32 1.0, %v1970_v27  ;;  %v2518_v58 = vadd.f32 %v1779_v62, %v2397_v23  ;;  %v628_v1 = vpop.f32.mrb[27].mxu0  ;;  %v1643_v60 = vmul.f32 -1.442695, %v2512_v48 }
 0x123   : > { %v1974_v56 = vpop.eup %1973  ;;  %1991 = vrcp.f32 %v770_v33  ;;  %v771_v57 = vadd.f32 1.0, %v1972_v51  ;;  %v2522_v61 = vadd.f32 %v2397_v23, %v628_v1  ;;  %v1641_v2 = vmul.f32 -1.442695, %v2515_v54 }
 0x124   : > { %v1976_v63 = vpop.eup %1975  ;;  %1993 = vrcp.f32 %v768_v55  ;;  %v769_v0 = vadd.f32 1.0, %v1974_v56  ;;  %1794 = vmatprep.mubr.msk.bf16.mxu1 %vm911_vm3, %v884_v53  ;;  %v1644_v4 = vmul.f32 -1.442695, %v2518_v58 }
 0x125   : > { %v1978_v3 = vpop.eup %1977  ;;  %1995 = vrcp.f32 %v771_v57  ;;  %1795 = vmatmul.mubr.msk.bf16.gmra.mrb[8].mxu1 %vm911_vm3, %v885_v50  ;;  %v1642_v6 = vmul.f32 -1.442695, %v2522_v61  ;;  %v862_v8 = vmul.f32 %v1976_v63, %v2448_v10 }
 0x126   : > { %v1980_v5 = vpop.eup %1979  ;;  %1997 = vrcp.f32 %v769_v0  ;;  %v860_v15 = vmul.f32 %v1978_v3, %v2451_v14 }
 0x127   : > { %v1982_v7 = vpop.eup %1981  ;;  %v863_v9 = vmul.f32 %v1980_v5, %v2455_v18  ;;  %1999 = vpow2.f32 %v1643_v60  ;;  %v1782_v11 = vpop.f32.mrb[28].mxu0 }
 0x128   : > { %v1984_v12 = vpop.eup %1983  ;;  %v861_v16 = vmul.f32 %v1982_v7, %v2459_v22  ;;  %2001 = vpow2.f32 %v1641_v2  ;;  %v2534_v37 = vadd.f32 %v1782_v11, %v2397_v23  ;;  %v641_v17 = vpop.f32.mrb[29].mxu0 }
 0x129   : > { %v1986_v39 = vpop.eup %1985  ;;  %v887_v19 = vpack.c.bf16 %v863_v9, %v862_v8  ;;  %v774_v45 = vadd.f32 1.0, %v1984_v12  ;;  %2003 = vpow2.f32 %v1644_v4  ;;  %v2537_v10 = vadd.f32 %v2397_v23, %v641_v17  ;;  %v1783_v18 = vpop.f32.mrb[30].mxu0 }
 0x12a   : > { %v1988_v20 = vpop.eup %1987  ;;  %v886_v24 = vpack.c.bf16 %v861_v16, %v860_v15  ;;  %v772_v26 = vadd.f32 1.0, %v1986_v39  ;;  %2005 = vpow2.f32 %v1642_v6  ;;  %v644_v14 = vpop.f32.mrb[31].mxu0  ;;  %v1647_v31 = vmul.f32 -1.442695, %v2534_v37 }
 0x12b   : > { %v1990_v28 = vpop.eup %1989  ;;  %2007 = vrcp.f32 %v774_v45  ;;  %v775_v22 = vadd.f32 1.0, %v1988_v20  ;;  %v2541_v32 = vadd.f32 %v1783_v18, %v2397_v23  ;;  %v1645_v35 = vmul.f32 -1.442695, %v2537_v10 }
 0x12c   : > { %2009 = vrcp.f32 %v772_v26  ;;  %v773_v34 = vadd.f32 1.0, %v1990_v28  ;;  %v2545_v36 = vadd.f32 %v2397_v23, %v644_v14  ;;  %1798 = vmatprep.mubr.msk.bf16.mxu1 %vm911_vm3, %v886_v24 }
 0x12d   : > { %v1992_v38 = vpop.eup %1991  ;;  %2011 = vrcp.f32 %v775_v22  ;;  %v1648_v40 = vmul.f32 -1.442695, %v2541_v32  ;;  %1799 = vmatmul.mubr.msk.bf16.gmra.mrb[12].mxu1 %vm911_vm3, %v887_v19 }
 0x12e   : > { %v1994_v41 = vpop.eup %1993  ;;  %2013 = vrcp.f32 %v773_v34  ;;  %v1646_v43 = vmul.f32 -1.442695, %v2545_v36  ;;  %v866_v25 = vmul.f32 %v1992_v38, %v2468_v46  ;;  %v1907_v34 = vld [vmem:[%s2845_s5] sm:$0xff]  }
 0x12f   : > { %v1996_v44 = vpop.eup %1995  ;;  %2015 = vpow2.f32 %v1647_v31  ;;  %v864_v27 = vmul.f32 %v1994_v41, %v2471_v30 }
 0x130   : > { %v1998_v47 = vpop.eup %1997  ;;  %v867_v23 = vmul.f32 %v1996_v44, %v2475_v52  ;;  %2017 = vpow2.f32 %v1645_v35  ;;  %v2248_v35 = vmov 0.0  }
 0x131   : > { %v2000_v49 = vpop.eup %1999  ;;  %v865_v50 = vmul.f32 %v1998_v47, %v2479_v59  ;;  %2019 = vpow2.f32 %v1648_v40  ;;  %1818 = vmatprep.subr.bf16.mxu1 %v2248_v35 }
 0x132   : > { %v2002_v33 = vpop.eup %2001  ;;  %v889_v62 = vpack.c.bf16 %v867_v23, %v866_v25  ;;  %v778_v51 = vadd.f32 1.0, %v2000_v49  ;;  %2021 = vpow2.f32 %v1646_v43  ;;  %1819 = vmatpush3.bf16.msra.mxu1 %v1907_v34 }
 0x133   : > { %v2004_v53 = vpop.eup %2003  ;;  %v888_v55 = vpack.c.bf16 %v865_v50, %v864_v27  ;;  %v776_v1 = vadd.f32 1.0, %v2002_v33  ;;  %1820 = vmatprep.subr.bf16.mxu1 %v2248_v35 }
 0x134   : > { %v2006_v56 = vpop.eup %2005  ;;  %2023 = vrcp.f32 %v778_v51  ;;  %v779_v57 = vadd.f32 1.0, %v2004_v53 }
 0x135   : > { %v2008_v46 = vpop.eup %2007  ;;  %2025 = vrcp.f32 %v776_v1  ;;  %v777_v52 = vadd.f32 1.0, %v2006_v56  ;;  %1802 = vmatprep.mubr.msk.bf16.mxu1 %vm911_vm3, %v888_v55 }
 0x136   : > { %v2010_v60 = vpop.eup %2009  ;;  %2027 = vrcp.f32 %v779_v57  ;;  %1803 = vmatmul.mubr.msk.bf16.gmra.mrb[16].mxu1 %vm911_vm3, %v889_v62  ;;  %v870_v63 = vmul.f32 %v2008_v46, %v2490_v13 }
 0x137   : > { %v2012_v30 = vpop.eup %2011  ;;  %2029 = vrcp.f32 %v777_v52  ;;  %v868_v3 = vmul.f32 %v2010_v60, %v2493_v42 }
 0x138   : > { %v2014_v59 = vpop.eup %2013  ;;  %v871_v0 = vmul.f32 %v2012_v30, %v2497_v21 }
 0x139   : > { %v2016_v2 = vpop.eup %2015  ;;  %v869_v4 = vmul.f32 %v2014_v59, %v2501_v29 }
 0x13a   : > { %v2018_v5 = vpop.eup %2017  ;;  %v891_v6 = vpack.c.bf16 %v871_v0, %v870_v63  ;;  %v782_v7 = vadd.f32 1.0, %v2016_v2 }
 0x13b   : > { %v2020_v8 = vpop.eup %2019  ;;  %v890_v9 = vpack.c.bf16 %v869_v4, %v868_v3  ;;  %v780_v11 = vadd.f32 1.0, %v2018_v5 }
 0x13c   : > { %v2022_v12 = vpop.eup %2021  ;;  %2031 = vrcp.f32 %v782_v7  ;;  %v783_v15 = vadd.f32 1.0, %v2020_v8 }
 0x13d   : > { %2033 = vrcp.f32 %v780_v11  ;;  %v781_v16 = vadd.f32 1.0, %v2022_v12  ;;  %1806 = vmatprep.mubr.msk.bf16.mxu1 %vm911_vm3, %v890_v9 }
 0x13e   : > { %v2024_v13 = vpop.eup %2023  ;;  %2035 = vrcp.f32 %v783_v15  ;;  %1807 = vmatmul.mubr.msk.bf16.gmra.mrb[20].mxu1 %vm911_vm3, %v891_v6 }
 0x13f   : > { %v2026_v42 = vpop.eup %2025  ;;  %2037 = vrcp.f32 %v781_v16  ;;  %v874_v17 = vmul.f32 %v2024_v13, %v2512_v48 }
 0x140   : > { %v2028_v21 = vpop.eup %2027  ;;  %v872_v19 = vmul.f32 %v2026_v42, %v2515_v54 }
 0x141   : > { %v2030_v29 = vpop.eup %2029  ;;  %v875_v39 = vmul.f32 %v2028_v21, %v2518_v58 }
 0x142   : > { %v873_v45 = vmul.f32 %v2030_v29, %v2522_v61 }
 0x143   : > { %v893_v18 = vpack.c.bf16 %v875_v39, %v874_v17 }
 0x144   : > { %v892_v20 = vpack.c.bf16 %v873_v45, %v872_v19 }
 0x146   : > { %v2032_v24 = vpop.eup %2031  ;;  %1810 = vmatprep.mubr.msk.bf16.mxu1 %vm911_vm3, %v892_v20 }
 0x147   : > { %v2034_v26 = vpop.eup %2033  ;;  %1811 = vmatmul.mubr.msk.bf16.gmra.mrb[24].mxu1 %vm911_vm3, %v893_v18  ;;  %v878_v22 = vmul.f32 %v2032_v24, %v2534_v37  ;;  %v1908_v37 = vld [vmem:[%s2845_s5 + $0x8] sm:$0xff]  }
 0x148   : > { %v2036_v14 = vpop.eup %2035  ;;  %v876_v58 = vmul.f32 %v2034_v26, %v2537_v10  ;;  %1821 = vmatpush3.bf16.msra.mxu1 %v1908_v37  ;;  %v1909_v10 = vld [vmem:[%s2845_s5 + $0x10] sm:$0xff]  }
 0x149   : > { %v2038_v28 = vpop.eup %2037  ;;  %v879_v48 = vmul.f32 %v2036_v14, %v2541_v32  ;;  %1822 = vmatprep.subr.bf16.mxu1 %v2248_v35  ;;  %v1910_v32 = vld [vmem:[%s2845_s5 + $0x18] sm:$0xff]  }
 0x14a   : > { %v877_v54 = vmul.f32 %v2038_v28, %v2545_v36  ;;  %v2590_v36 = vld [vmem:[%s2844_s4] ss:$0 sm:$0xff] }
 0x14b   : > { %v895_v31 = vpack.c.bf16 %v879_v48, %v878_v22 }
 0x14c   : > { %v894_v61 = vpack.c.bf16 %v877_v54, %v876_v58  ;;  %1823 = vmatpush3.bf16.msra.mxu1 %v1909_v10 }
 0x14d   : > { %1824 = vmatprep.subr.bf16.mxu1 %v2248_v35 }
 0x14e   : > { %1814 = vmatprep.mubr.msk.bf16.mxu1 %vm911_vm3, %v894_v61 }
 0x14f   : > { %1815 = vmatmul.mubr.msk.bf16.gmra.mrb[28].mxu1 %vm911_vm3, %v895_v31 }
 0x150   : > { %1825 = vmatpush3.bf16.msra.mxu1 %v1910_v32  ;;  %1826 = vmatprep.mubr.msk.bf16.mxu1 %vm2249_vm4, %v2248_v35 }
 0x1e7   : > { %v1788_v38 = vpop.f32.mrb[0].mxu1 }
 0x1e8   : > { %v2593_v40 = vadd.f32 %v1788_v38, %v2590_v36  ;;  %v994_v41 = vpop.f32.mrb[1].mxu1 }
 0x1e9   : > { %v2596_v43 = vadd.f32 %v2590_v36, %v994_v41  ;;  %v1789_v44 = vpop.f32.mrb[2].mxu1 }
 0x1ea   : > { %v1669_v47 = vmul.f32 -1.442695, %v2593_v40  ;;  %v2600_v25 = vadd.f32 %v1789_v44, %v2590_v36  ;;  %v997_v23 = vpop.f32.mrb[3].mxu1 }
 0x1eb   : > { %v1667_v49 = vmul.f32 -1.442695, %v2596_v43  ;;  %v2604_v27 = vadd.f32 %v2590_v36, %v997_v23 }
 0x1ec   : > { %2039 = vpow2.f32 %v1669_v47  ;;  %v1670_v50 = vmul.f32 -1.442695, %v2600_v25 }
 0x1ed   : > { %2041 = vpow2.f32 %v1667_v49  ;;  %v1668_v33 = vmul.f32 -1.442695, %v2604_v27 }
 0x1ee   : > { %2043 = vpow2.f32 %v1670_v50 }
 0x1ef   : > { %2045 = vpow2.f32 %v1668_v33  ;;  %v1792_v62 = vpop.f32.mrb[4].mxu1 }
 0x1f0   : > { %v2609_v51 = vadd.f32 %v1792_v62, %v2590_v36  ;;  %v1010_v53 = vpop.f32.mrb[5].mxu1 }
 0x1f1   : > { %v2612_v55 = vadd.f32 %v2590_v36, %v1010_v53  ;;  %v1793_v1 = vpop.f32.mrb[6].mxu1 }
 0x1f2   : > { %v1673_v56 = vmul.f32 -1.442695, %v2609_v51  ;;  %v2616_v57 = vadd.f32 %v1793_v1, %v2590_v36  ;;  %v1013_v46 = vpop.f32.mrb[7].mxu1 }
 0x1f3   : > { %v1671_v52 = vmul.f32 -1.442695, %v2612_v55  ;;  %v2620_v60 = vadd.f32 %v2590_v36, %v1013_v46 }
 0x1f4   : > { %2047 = vpow2.f32 %v1673_v56  ;;  %v1674_v30 = vmul.f32 -1.442695, %v2616_v57 }
 0x1f5   : > { %2049 = vpow2.f32 %v1671_v52  ;;  %v1672_v59 = vmul.f32 -1.442695, %v2620_v60 }
 0x1f6   : > { %v2040_v63 = vpop.eup %2039  ;;  %2051 = vpow2.f32 %v1674_v30 }
 0x1f7   : > { %v2042_v0 = vpop.eup %2041  ;;  %v1219_v2 = vadd.f32 1.0, %v2040_v63  ;;  %2053 = vpow2.f32 %v1672_v59 }
 0x1f8   : > { %v2044_v3 = vpop.eup %2043  ;;  %v1217_v4 = vadd.f32 1.0, %v2042_v0  ;;  %v1796_v5 = vpop.f32.mrb[8].mxu1 }
 0x1f9   : > { %v2046_v6 = vpop.eup %2045  ;;  %2055 = vrcp.f32 %v1219_v2  ;;  %v1220_v7 = vadd.f32 1.0, %v2044_v3  ;;  %v2625_v8 = vadd.f32 %v1796_v5, %v2590_v36  ;;  %v1026_v9 = vpop.f32.mrb[9].mxu1 }
 0x1fa   : > { %2057 = vrcp.f32 %v1217_v4  ;;  %v1218_v11 = vadd.f32 1.0, %v2046_v6  ;;  %v2628_v12 = vadd.f32 %v2590_v36, %v1026_v9  ;;  %v1797_v15 = vpop.f32.mrb[10].mxu1 }
 0x1fb   : > { %2059 = vrcp.f32 %v1220_v7  ;;  %v1677_v16 = vmul.f32 -1.442695, %v2625_v8  ;;  %v2632_v13 = vadd.f32 %v1797_v15, %v2590_v36  ;;  %v1029_v42 = vpop.f32.mrb[11].mxu1 }
 0x1fc   : > { %2061 = vrcp.f32 %v1218_v11  ;;  %v1675_v21 = vmul.f32 -1.442695, %v2628_v12  ;;  %v2636_v29 = vadd.f32 %v2590_v36, %v1029_v42 }
 0x1fd   : > { %2063 = vpow2.f32 %v1677_v16  ;;  %v1678_v17 = vmul.f32 -1.442695, %v2632_v13 }
 0x1fe   : > { %v2048_v39 = vpop.eup %2047  ;;  %2065 = vpow2.f32 %v1675_v21  ;;  %v1676_v19 = vmul.f32 -1.442695, %v2636_v29 }
 0x1ff   : > { %v2050_v45 = vpop.eup %2049  ;;  %v1223_v18 = vadd.f32 1.0, %v2048_v39  ;;  %2067 = vpow2.f32 %v1678_v17 }
 0x200   : > { %v2052_v20 = vpop.eup %2051  ;;  %v1221_v24 = vadd.f32 1.0, %v2050_v45  ;;  %2069 = vpow2.f32 %v1676_v19  ;;  %v1800_v26 = vpop.f32.mrb[12].mxu1 }
 0x201   : > { %v2054_v14 = vpop.eup %2053  ;;  %2071 = vrcp.f32 %v1223_v18  ;;  %v1224_v28 = vadd.f32 1.0, %v2052_v20  ;;  %v2641_v22 = vadd.f32 %v1800_v26, %v2590_v36  ;;  %v1042_v48 = vpop.f32.mrb[13].mxu1 }
 0x202   : > { %2073 = vrcp.f32 %v1221_v24  ;;  %v1222_v58 = vadd.f32 1.0, %v2054_v14  ;;  %v2644_v54 = vadd.f32 %v2590_v36, %v1042_v48  ;;  %v1801_v31 = vpop.f32.mrb[14].mxu1 }
 0x203   : > { %v2056_v61 = vpop.eup %2055  ;;  %2075 = vrcp.f32 %v1224_v28  ;;  %v1681_v34 = vmul.f32 -1.442695, %v2641_v22  ;;  %v2648_v35 = vadd.f32 %v1801_v31, %v2590_v36  ;;  %v1045_v37 = vpop.f32.mrb[15].mxu1 }
 0x204   : > { %v2058_v10 = vpop.eup %2057  ;;  %2077 = vrcp.f32 %v1222_v58  ;;  %v1679_v32 = vmul.f32 -1.442695, %v2644_v54  ;;  %v2652_v38 = vadd.f32 %v2590_v36, %v1045_v37  ;;  %v1315_v44 = vmul.f32 %v2056_v61, %v2593_v40 }
 0x205   : > { %v2060_v41 = vpop.eup %2059  ;;  %v1313_v47 = vmul.f32 %v2058_v10, %v2596_v43  ;;  %2079 = vpow2.f32 %v1681_v34  ;;  %v1682_v23 = vmul.f32 -1.442695, %v2648_v35 }
 0x206   : > { %v2062_v49 = vpop.eup %2061  ;;  %2081 = vpow2.f32 %v1679_v32  ;;  %v1680_v50 = vmul.f32 -1.442695, %v2652_v38  ;;  %v1316_v62 = vmul.f32 %v2060_v41, %v2600_v25  ;;  %v1349_v43 = vsel %vm1345_vm5, %v1315_v44, 0.0 }
 0x207   : > { %v2064_v33 = vpop.eup %2063  ;;  %v1314_v53 = vmul.f32 %v2062_v49, %v2604_v27  ;;  %2083 = vpow2.f32 %v1682_v23  ;;  %v1346_v46 = vsel %vm1345_vm5, %v1313_v47, 0.0 }
 0x208   : > { %v2066_v1 = vpop.eup %2065  ;;  %v1227_v56 = vadd.f32 1.0, %v2064_v33  ;;  %2085 = vpow2.f32 %v1680_v50  ;;  %v1351_v4 = vsel %vm1345_vm5, %v1316_v62, 0.0 }
 0x209   : > { %v2068_v40 = vpop.eup %2067  ;;  %v1347_v52 = vsel %vm1345_vm5, %v1314_v53, 0.0  ;;  %v1225_v30 = vadd.f32 1.0, %v2066_v1  ;;  %v1804_v59 = vpop.f32.mrb[16].mxu1 }
 0x20a   : > { %v2070_v63 = vpop.eup %2069  ;;  %v1348_v0 = vadd.f32 %v1347_v52, %v1346_v46  ;;  %2087 = vrcp.f32 %v1227_v56  ;;  %v1228_v2 = vadd.f32 1.0, %v2068_v40  ;;  %v2664_v25 = vadd.f32 %v1804_v59, %v2590_v36  ;;  %v1058_v27 = vpop.f32.mrb[17].mxu1 }
 0x20b   : > { %v2072_v3 = vpop.eup %2071  ;;  %2089 = vrcp.f32 %v1225_v30  ;;  %v1226_v5 = vadd.f32 1.0, %v2070_v63  ;;  %v2668_v6 = vadd.f32 %v2590_v36, %v1058_v27  ;;  %v1805_v7 = vpop.f32.mrb[18].mxu1 }
 0x20c   : > { %v2074_v9 = vpop.eup %2073  ;;  %v1350_v11 = vadd.f32 %v1349_v43, %v1348_v0  ;;  %v1319_v15 = vmul.f32 %v2072_v3, %v2609_v51  ;;  %2091 = vrcp.f32 %v1228_v2  ;;  %v1685_v16 = vmul.f32 -1.442695, %v2664_v25  ;;  %v1061_v42 = vpop.f32.mrb[19].mxu1 }
 0x20d   : > { %v2076_v21 = vpop.eup %2075  ;;  %v1317_v17 = vmul.f32 %v2074_v9, %v2612_v55  ;;  %2093 = vrcp.f32 %v1226_v5  ;;  %v1683_v39 = vmul.f32 -1.442695, %v2668_v6  ;;  %v2675_v19 = vadd.f32 %v1805_v7, %v2590_v36 }
 0x20e   : > { %v2078_v45 = vpop.eup %2077  ;;  %v1352_v18 = vadd.f32 %v1351_v4, %v1350_v11  ;;  %2095 = vpow2.f32 %v1685_v16  ;;  %v1357_v55 = vsel %vm1345_vm5, %v1319_v15, 0.0  ;;  %v2682_v58 = vadd.f32 %v2590_v36, %v1061_v42 }
 0x20f   : > { %v2080_v20 = vpop.eup %2079  ;;  %v1353_v24 = vsel %vm1345_vm5, %v1317_v17, 0.0  ;;  %v1318_v51 = vmul.f32 %v2078_v45, %v2620_v60  ;;  %2097 = vpow2.f32 %v1683_v39  ;;  %v1686_v26 = vmul.f32 -1.442695, %v2675_v19 }
 0x210   : > { %v2082_v14 = vpop.eup %2081  ;;  %v1354_v28 = vadd.f32 %v1353_v24, %v1352_v18  ;;  %v1231_v48 = vadd.f32 1.0, %v2080_v20  ;;  %v1320_v61 = vmul.f32 %v2076_v21, %v2616_v57  ;;  %v1684_v44 = vmul.f32 -1.442695, %v2682_v58 }
 0x211   : > { %v2084_v31 = vpop.eup %2083  ;;  %v1355_v34 = vsel %vm1345_vm5, %v1318_v51, 0.0  ;;  %v1229_v37 = vadd.f32 1.0, %v2082_v14  ;;  %2099 = vpow2.f32 %v1686_v26  ;;  %v1808_v10 = vpop.f32.mrb[20].mxu1 }
 0x212   : > { %v2086_v60 = vpop.eup %2085  ;;  %v1356_v32 = vadd.f32 %v1355_v34, %v1354_v28  ;;  %2101 = vrcp.f32 %v1231_v48  ;;  %v1232_v41 = vadd.f32 1.0, %v2084_v31  ;;  %v1074_v47 = vpop.f32.mrb[21].mxu1  ;;  %v2688_v49 = vadd.f32 %v1808_v10, %v2590_v36 }
 0x213   : > { %2103 = vrcp.f32 %v1229_v37  ;;  %v1230_v23 = vadd.f32 1.0, %v2086_v60  ;;  %v2691_v50 = vadd.f32 %v2590_v36, %v1074_v47  ;;  %v1809_v57 = vpop.f32.mrb[22].mxu1  ;;  %v1359_v40 = vsel %vm1345_vm5, %v1320_v61, 0.0 }
 0x214   : > { %v2088_v33 = vpop.eup %2087  ;;  %v1358_v62 = vadd.f32 %v1357_v55, %v1356_v32  ;;  %2105 = vrcp.f32 %v1232_v41  ;;  %v2694_v53 = vadd.f32 %v1809_v57, %v2590_v36  ;;  %v1077_v1 = vpop.f32.mrb[23].mxu1  ;;  %v1689_v43 = vmul.f32 -1.442695, %v2688_v49 }
 0x215   : > { %v2090_v56 = vpop.eup %2089  ;;  %2107 = vrcp.f32 %v1230_v23  ;;  %v1687_v46 = vmul.f32 -1.442695, %v2691_v50  ;;  %v1323_v2 = vmul.f32 %v2088_v33, %v2625_v8  ;;  %v2703_v27 = vadd.f32 %v2590_v36, %v1077_v1 }
 0x216   : > { %v2092_v52 = vpop.eup %2091  ;;  %v1321_v30 = vmul.f32 %v2090_v56, %v2628_v12  ;;  %v1360_v59 = vadd.f32 %v1359_v40, %v1358_v62  ;;  %2109 = vpow2.f32 %v1684_v44  ;;  %v1690_v63 = vmul.f32 -1.442695, %v2694_v53 }
 0x217   : > { %v2094_v0 = vpop.eup %2093  ;;  %2111 = vpow2.f32 %v1689_v43  ;;  %v1324_v5 = vmul.f32 %v2092_v52, %v2632_v13  ;;  %v1688_v8 = vmul.f32 -1.442695, %v2703_v27  ;;  %v1365_v17 = vsel %vm1345_vm5, %v1323_v2, 0.0 }
 0x218   : > { %v2096_v3 = vpop.eup %2095  ;;  %v1361_v4 = vsel %vm1345_vm5, %v1321_v30, 0.0  ;;  %v1322_v7 = vmul.f32 %v2094_v0, %v2636_v29  ;;  %2113 = vpow2.f32 %v1687_v46 }
 0x219   : > { %v2098_v12 = vpop.eup %2097  ;;  %v1362_v9 = vadd.f32 %v1361_v4, %v1360_v59  ;;  %2115 = vpow2.f32 %v1690_v63  ;;  %v1235_v15 = vadd.f32 1.0, %v2096_v3  ;;  %v1367_v18 = vsel %vm1345_vm5, %v1324_v5, 0.0 }
 0x21a   : > { %v1363_v11 = vsel %vm1345_vm5, %v1322_v7, 0.0  ;;  %v1233_v16 = vadd.f32 1.0, %v2098_v12  ;;  %v1812_v42 = vpop.f32.mrb[24].mxu1 }
 0x21b   : > { %v2100_v21 = vpop.eup %2099  ;;  %v1364_v39 = vadd.f32 %v1363_v11, %v1362_v9  ;;  %v2712_v45 = vadd.f32 %v1812_v42, %v2590_v36  ;;  %v1090_v13 = vpop.f32.mrb[25].mxu1 }
 0x21c   : > { %v2102_v29 = vpop.eup %2101  ;;  %2117 = vrcp.f32 %v1233_v16  ;;  %v1236_v20 = vadd.f32 1.0, %v2100_v21  ;;  %v2716_v24 = vadd.f32 %v2590_v36, %v1090_v13  ;;  %v1813_v51 = vpop.f32.mrb[26].mxu1 }
 0x21d   : > { %v2104_v26 = vpop.eup %2103  ;;  %v1366_v14 = vadd.f32 %v1365_v17, %v1364_v39  ;;  %v1327_v55 = vmul.f32 %v2102_v29, %v2641_v22  ;;  %2119 = vpow2.f32 %v1688_v8  ;;  %v1693_v28 = vmul.f32 -1.442695, %v2712_v45  ;;  %v1093_v48 = vpop.f32.mrb[27].mxu1 }
 0x21e   : > { %v2106_v31 = vpop.eup %2105  ;;  %v1325_v61 = vmul.f32 %v2104_v26, %v2644_v54  ;;  %2121 = vrcp.f32 %v1235_v15  ;;  %v1691_v34 = vmul.f32 -1.442695, %v2716_v24  ;;  %v2723_v37 = vadd.f32 %v1813_v51, %v2590_v36 }
 0x21f   : > { %v2108_v10 = vpop.eup %2107  ;;  %v1373_v60 = vsel %vm1345_vm5, %v1327_v55, 0.0  ;;  %v1368_v32 = vadd.f32 %v1367_v18, %v1366_v14  ;;  %2123 = vrcp.f32 %v1236_v20  ;;  %v2730_v33 = vadd.f32 %v2590_v36, %v1093_v48 }
 0x220   : > { %v2110_v41 = vpop.eup %2109  ;;  %v1369_v22 = vsel %vm1345_vm5, %v1325_v61, 0.0  ;;  %v1326_v44 = vmul.f32 %v2108_v10, %v2652_v38  ;;  %2125 = vpow2.f32 %v1691_v34  ;;  %v1694_v47 = vmul.f32 -1.442695, %v2723_v37 }
 0x221   : > { %v2112_v54 = vpop.eup %2111  ;;  %v1370_v23 = vadd.f32 %v1369_v22, %v1368_v32  ;;  %v1234_v57 = vadd.f32 1.0, %v2110_v41  ;;  %2127 = vpow2.f32 %v1693_v28  ;;  %v1328_v1 = vmul.f32 %v2106_v31, %v2648_v35 }
 0x222   : > { %v2114_v62 = vpop.eup %2113  ;;  %v1371_v56 = vsel %vm1345_vm5, %v1326_v44, 0.0  ;;  %v1239_v40 = vadd.f32 1.0, %v2112_v54  ;;  %2129 = vpow2.f32 %v1694_v47  ;;  %v1816_v43 = vpop.f32.mrb[28].mxu1  ;;  %v1692_v30 = vmul.f32 -1.442695, %v2730_v33 }
 0x223   : > { %v2116_v46 = vpop.eup %2115  ;;  %v1372_v38 = vadd.f32 %v1371_v56, %v1370_v23  ;;  %2131 = vrcp.f32 %v1234_v57  ;;  %v1237_v52 = vadd.f32 1.0, %v2114_v62  ;;  %v1106_v59 = vpop.f32.mrb[29].mxu1  ;;  %v2736_v0 = vadd.f32 %v1816_v43, %v2590_v36 }
 0x224   : > { %2133 = vrcp.f32 %v1239_v40  ;;  %v1240_v63 = vadd.f32 1.0, %v2116_v46  ;;  %v2739_v2 = vadd.f32 %v2590_v36, %v1106_v59  ;;  %v1817_v35 = vpop.f32.mrb[30].mxu1  ;;  %v1375_v12 = vsel %vm1345_vm5, %v1328_v1, 0.0 }
 0x225   : > { %v1374_v3 = vadd.f32 %v1373_v60, %v1372_v38  ;;  %2135 = vrcp.f32 %v1237_v52  ;;  %v2742_v4 = vadd.f32 %v1817_v35, %v2590_v36  ;;  %v1109_v5 = vpop.f32.mrb[31].mxu1  ;;  %v1697_v9 = vmul.f32 -1.442695, %v2736_v0 }
 0x226   : > { %v2118_v7 = vpop.eup %2117  ;;  %2137 = vrcp.f32 %v1240_v63  ;;  %v1695_v11 = vmul.f32 -1.442695, %v2739_v2  ;;  %v2750_v39 = vadd.f32 %v2590_v36, %v1109_v5 }
 0x227   : > { %v2120_v15 = vpop.eup %2119  ;;  %v1329_v16 = vmul.f32 %v2118_v7, %v2668_v6  ;;  %v1376_v8 = vadd.f32 %v1375_v12, %v1374_v3  ;;  %2139 = vpow2.f32 %v1692_v30  ;;  %v1698_v42 = vmul.f32 -1.442695, %v2742_v4 }
 0x228   : > { %v2122_v21 = vpop.eup %2121  ;;  %v1238_v17 = vadd.f32 1.0, %v2120_v15  ;;  %2141 = vpow2.f32 %v1697_v9  ;;  %v1696_v51 = vmul.f32 -1.442695, %v2750_v39 }
 0x229   : > { %v2124_v13 = vpop.eup %2123  ;;  %v1377_v29 = vsel %vm1345_vm5, %v1329_v16, 0.0  ;;  %2143 = vpow2.f32 %v1695_v11  ;;  %v1331_v48 = vmul.f32 %v2122_v21, %v2664_v25 }
 0x22a   : > { %v2126_v18 = vpop.eup %2125  ;;  %v1378_v20 = vadd.f32 %v1377_v29, %v1376_v8  ;;  %2145 = vrcp.f32 %v1238_v17  ;;  %v1332_v60 = vmul.f32 %v2124_v13, %v2675_v19 }
 0x22b   : > { %v2128_v6 = vpop.eup %2127  ;;  %v1241_v26 = vadd.f32 1.0, %v2126_v18  ;;  %2147 = vpow2.f32 %v1698_v42  ;;  %v1381_v54 = vsel %vm1345_vm5, %v1331_v48, 0.0 }
 0x22c   : > { %v2130_v14 = vpop.eup %2129  ;;  %v1243_v31 = vadd.f32 1.0, %v2128_v6  ;;  %v1383_v62 = vsel %vm1345_vm5, %v1332_v60, 0.0 }
 0x22d   : > { %v2132_v55 = vpop.eup %2131  ;;  %2149 = vrcp.f32 %v1241_v26  ;;  %v1244_v34 = vadd.f32 1.0, %v2130_v14 }
 0x22e   : > { %v2134_v28 = vpop.eup %2133  ;;  %v1330_v36 = vmul.f32 %v2132_v55, %v2682_v58  ;;  %2151 = vpow2.f32 %v1696_v51 }
 0x22f   : > { %v2136_v61 = vpop.eup %2135  ;;  %2153 = vrcp.f32 %v1243_v31  ;;  %v1335_v43 = vmul.f32 %v2134_v28, %v2688_v49 }
 0x230   : > { %v2138_v10 = vpop.eup %2137  ;;  %v1379_v32 = vsel %vm1345_vm5, %v1330_v36, 0.0  ;;  %v1333_v41 = vmul.f32 %v2136_v61, %v2691_v50  ;;  %2155 = vrcp.f32 %v1244_v34 }
 0x231   : > { %v2140_v22 = vpop.eup %2139  ;;  %v1380_v44 = vadd.f32 %v1379_v32, %v1378_v20  ;;  %v1336_v63 = vmul.f32 %v2138_v10, %v2694_v53  ;;  %v1389_v12 = vsel %vm1345_vm5, %v1335_v43, 0.0 }
 0x232   : > { %v2142_v47 = vpop.eup %2141  ;;  %v1242_v25 = vadd.f32 1.0, %v2140_v22  ;;  %v1385_v1 = vsel %vm1345_vm5, %v1333_v41, 0.0 }
 0x233   : > { %v2144_v23 = vpop.eup %2143  ;;  %v1382_v58 = vadd.f32 %v1381_v54, %v1380_v44  ;;  %v1247_v46 = vadd.f32 1.0, %v2142_v47  ;;  %v1391_v9 = vsel %vm1345_vm5, %v1336_v63, 0.0 }
 0x234   : > { %v2146_v57 = vpop.eup %2145  ;;  %2157 = vrcp.f32 %v1242_v25  ;;  %v1245_v19 = vadd.f32 1.0, %v2144_v23 }
 0x235   : > { %v2148_v56 = vpop.eup %2147  ;;  %v1384_v40 = vadd.f32 %v1383_v62, %v1382_v58  ;;  %v1334_v50 = vmul.f32 %v2146_v57, %v2703_v27 }
 0x236   : > { %2159 = vrcp.f32 %v1245_v19  ;;  %v1248_v3 = vadd.f32 1.0, %v2148_v56 }
 0x237   : > { %v2150_v38 = vpop.eup %2149  ;;  %v1386_v52 = vadd.f32 %v1385_v1, %v1384_v40  ;;  %v1387_v30 = vsel %vm1345_vm5, %v1334_v50, 0.0  ;;  %2161 = vrcp.f32 %v1247_v46 }
 0x238   : > { %v2152_v59 = vpop.eup %2151  ;;  %v1337_v35 = vmul.f32 %v2150_v38, %v2716_v24 }
 0x239   : > { %v1388_v5 = vadd.f32 %v1387_v30, %v1386_v52  ;;  %v1246_v7 = vadd.f32 1.0, %v2152_v59  ;;  %v2154_v49 = vpop.eup %2153 }
 0x23a   : > { %v1393_v11 = vsel %vm1345_vm5, %v1337_v35, 0.0  ;;  %v2156_v15 = vpop.eup %2155  ;;  %v1339_v53 = vmul.f32 %v2154_v49, %v2712_v45 }
 0x23b   : > { %v1390_v27 = vadd.f32 %v1389_v12, %v1388_v5  ;;  %2163 = vrcp.f32 %v1246_v7  ;;  %v1340_v17 = vmul.f32 %v2156_v15, %v2723_v37 }
 0x23c   : > { %2165 = vrcp.f32 %v1248_v3  ;;  %v1397_v20 = vsel %vm1345_vm5, %v1339_v53, 0.0 }
 0x23d   : > { %v1392_v16 = vadd.f32 %v1391_v9, %v1390_v27  ;;  %v1399_v14 = vsel %vm1345_vm5, %v1340_v17, 0.0 }
 0x23e   : > { %v2158_v8 = vpop.eup %2157 }
 0x23f   : > { %v1394_v24 = vadd.f32 %v1393_v11, %v1392_v16  ;;  %v1338_v42 = vmul.f32 %v2158_v8, %v2730_v33 }
 0x240   : > { %v2160_v21 = vpop.eup %2159 }
 0x241   : > { %v1395_v13 = vsel %vm1345_vm5, %v1338_v42, 0.0  ;;  %v1341_v29 = vmul.f32 %v2160_v21, %v2739_v2  ;;  %v2162_v51 = vpop.eup %2161 }
 0x242   : > { %v1396_v18 = vadd.f32 %v1395_v13, %v1394_v24  ;;  %v1343_v37 = vmul.f32 %v2162_v51, %v2736_v0 }
 0x243   : > { %v1401_v45 = vsel %vm1345_vm5, %v1341_v29, 0.0 }
 0x244   : > { %v1398_v6 = vadd.f32 %v1397_v20, %v1396_v18  ;;  %v1405_v61 = vsel %vm1345_vm5, %v1343_v37, 0.0 }
 0x245   : > { %v2164_v26 = vpop.eup %2163 }
 0x246   : > { %v2166_v55 = vpop.eup %2165  ;;  %v1400_v28 = vadd.f32 %v1399_v14, %v1398_v6  ;;  %v1342_v33 = vmul.f32 %v2164_v26, %v2750_v39 }
 0x247   : > { %v1344_v36 = vmul.f32 %v2166_v55, %v2742_v4  ;;  %v1424_v4 = vld [vmem:[%s2846_s6] sm:$0x1] }
 0x248   : > { %v1402_v48 = vadd.f32 %v1401_v45, %v1400_v28  ;;  %v1403_v2 = vsel %vm1345_vm5, %v1342_v33, 0.0 }
 0x249   : > { %v1407_v10 = vsel %vm1345_vm5, %v1344_v36, 0.0 }
 0x24a   : > { %v1404_v31 = vadd.f32 %v1403_v2, %v1402_v48 }
 0x24c   : > { %v1406_v34 = vadd.f32 %v1405_v61, %v1404_v31 }
 0x24e   : > { %v1408_v60 = vadd.f32 %v1407_v10, %v1406_v34 }
 0x250   : > { %v1409_v32 = vrot.slane %v1408_v60, 4 }
 0x252   : > { %v1410_v41 = vadd.f32 %v1409_v32, %v1408_v60 }
 0x254   : > { %v1411_v22 = vrot.slane %v1410_v41, 2 }
 0x256   : > { %v1412_v39 = vadd.f32 %v1411_v22, %v1410_v41 }
 0x258   : > { %v1413_v44 = vrot.slane %v1412_v39, 1 }
 0x25a   : > { %v1414_v0 = vadd.f32 %v1413_v44, %v1412_v39 }
 0x25c   : > { %v1415_v47 = vpack.c.bf16 %v1414_v0, %v1414_v0 }
 0x25e   : > { %1827 = vmatmul.mubr.msk.bf16.vlgmr.msra.gmra.mrb[32].mxu1 %vm1345_vm5, %v1415_v47 }
 0x331   : > { %v1486_v54 = vpop.f32.mrb[32].mxu1 }
 0x332   : > { %v1487_v25 = vadd.f32 %v1486_v54, %v1424_v4  ;;  %v1828_v23 = vpop.f32.mrb[33].mxu1 }
 0x333   : > { %v1489_v58 = vpop.f32.mrb[34].mxu1 }
 0x334   : > { %1492 = vst [vmem:[%s293_s16] sm:$0x1] %v1487_v25  ;;  %v1829_v57 = vpop.f32.mrb[35].mxu1 }
 0x335   : > { %2180 = shalt.err (!%p2177_p5)
}
 0x336   : > { %s2181_s8 = scalar_lea.hbm %s2793_s20, 16  ;;  %s2185_s15 = scalar_lea.hbm %s2847_s7, 32 }
 0x337   : > { %p2182_p6 = scmp.ne.s32.totalorder %s2793_s20, %s2181_s8  ;;  %p2186_p10 = scmp.lt.u32.totalorder %s2793_s20, %s2847_s7 }
 0x338   : > { %p2187_p11 = scmp.lt.u32.totalorder %s2185_s15, %s2181_s8  ;;  %p2189_p13 = scmp.lt.u32.totalorder %s2181_s8, %s2793_s20 }
 0x339   : > { %p2183_p7 = pnand %p2182_p6, %p2331_p4 }
 0x33a   : > { %p2188_p12 = por %p2187_p11, %p2186_p10 }
 0x33b   : > { %p2184_p9 = pneg %p2183_p7 }
 0x33c   : > { %p2190_p0 = por %p2189_p13, %p2188_p12 }
 0x33e   : > { %p2191_p1 = pnand %p2190_p0, %p2184_p9 }
 0x340   : > { %2194 = shalt.err (!%p2191_p1)
}
 0x341   : > { %1830 = dma.vmem_to_hbm [thread:$0]  (%p2331_p4), %s2795_s17, 16, %s2793_s20, %s1494_s21  }
 0x342 PF: > { %p1836_p2 = scmp.ge.s32.totalorder %s2245_s29, 2  ;;  %s1518_s19 = sand.u32 1, %s2225_s24  }
 0x343   : > { %s1519_s27 = scalar_lea.sflag [#allocation3], %s1518_s19 }
 0x344   : > { %p1833_p3 = pnand %p1836_p2, %p2338_p8 }
 0x346   : > { %2220 = dma.done.wait (!%p1833_p3), %s1519_s27, 16  }
 0x347   : > { %2222 = vsyncadd (!%p1833_p3), %s1519_s27, 4294967280  ;;  %s20_s29 = sadd.s32 1, %s2245_s29   ;;  %s2850_s24 = smov %s2229_s25 }
 0x348   : > { %p17_p5 = scmp.ge.s32.totalorder %s20_s29, 4   ;;  %s2851_s25 = smov %s2233_s26 }
 0x349   : > { %s2852_s26 = smov %s2344_s14  ;;  %s2853_s27 = smov %s2241_s28 }
 0x34a   : > { %s2854_s28 = smov %s2856_s9  ;;  %19 = sbr.rel (!%p17_p5) target bundleno = 4 (0x4), region = 83 }
 0x351   :  { %1523 = vsyncpa [#allocation3], 1 }
 0x352   :  { %1525 = vsyncpa [#allocation3 + $0x1], 1 }

</bundles_post_ra>
